<compile_context>
chip_gen: v7x
topology: tpu7x:2x2x1
jax: 0.10.0
libtpu: 0.0.40
codegen_flags: <defaults>
</compile_context>

<pallas_src>
import functools

import jax
import jax.numpy as jnp
from jax.experimental import pallas as pl
from jax.experimental.pallas import tpu as pltpu


# ------------------------------ Pallas kernel --------------------------------
def _encoder_kernel(xq_ref, w1f_ref, w1lo_ref, w1hi_ref, b1_ref,
                    w2_ref, b2_ref, w3_ref, b3_ref,
                    o_ref, h1o_ref, h1e_ref, *, C, T2, BB, neg_slope):
    """Fused conv1 + LReLU + conv2 + LReLU + linear for a block of BB batch rows.

    xq_ref : (BB, T2+1, 4C)  bf16, quad-folded zero-padded input
    w1f_ref: (4C, H)         conv1 taps 0..3 stacked on the contraction dim
    w1lo   : (2C, H)         conv1 taps 0,1 ; w1hi: (2C, H) taps 2,3
    w2_ref : (4, H, O)       conv2 per-tap (in, out)
    w3_ref : (O, O)          linear (in, out)
    b*_ref : (1, N) f32      biases
    o_ref  : (BB, T2, O)     output block
    h1o/h1e: (BB, T2+1, H)   bf16 VMEM scratch: odd/even conv1 planes with a 1-row halo
    """
    f32 = jnp.float32
    bf16 = jnp.bfloat16
    H = w1f_ref.shape[-1]

    def lrelu(v):
        return jnp.maximum(v, jnp.float32(neg_slope) * v)

    # Weights / biases stay VMEM-resident for the whole grid (constant index_maps).
    w1f, w1lo, w1hi = w1f_ref[...], w1lo_ref[...], w1hi_ref[...]
    w2_0, w2_1, w2_2, w2_3 = w2_ref[0], w2_ref[1], w2_ref[2], w2_ref[3]
    w3 = w3_ref[...]
    b1, b2, b3 = b1_ref[...], b2_ref[...], b3_ref[...]

    zrow = jnp.zeros((1, H), bf16)

    for b in range(BB):                                  # unrolled batch sub-block
        # ---- Conv1d(C->H, k=4, s=2, p=1), taps folded into the contraction dim ----
        # even output rows t=2s use padded rows 4s..4s+3  == quad row s        (K = 4C)
        acc_e = jnp.dot(xq_ref[b, 0:T2, :], w1f, preferred_element_type=f32)
        # odd output rows t=2s+1 use padded rows 4s+2..4s+5
        #   == hi half of quad s (taps 0,1) + lo half of quad s+1 (taps 2,3)   (K = 2C each)
        acc_o = (jnp.dot(xq_ref[b, 0:T2, 2 * C:], w1lo, preferred_element_type=f32)
                 + jnp.dot(xq_ref[b, 1:T2 + 1, 0:2 * C], w1hi, preferred_element_type=f32))
        h1e = lrelu(acc_e + b1).astype(bf16)             # h1[2s]   , post-bias/LReLU
        h1o = lrelu(acc_o + b1).astype(bf16)             # h1[2s+1]

        # Stash the planes with a one-row halo so conv2's shifted taps are contiguous
        # reads.  Border rows are re-zeroed per step (two tiny 1xH stores) -- unlike a
        # pl.when(program_id==0) init this stays correct if the parallel grid is split
        # across TensorCores.
        h1o_ref[b, 0:1, :] = zrow                        # h1[-1]  = 0 (conv2 left pad)
        h1o_ref[b, 1:T2 + 1, :] = h1o
        h1e_ref[b, 0:T2, :] = h1e
        h1e_ref[b, T2:T2 + 1, :] = zrow                  # h1[T1]  = 0 (conv2 right pad)

        # ---- Conv1d(H->O, k=4, s=2, p=1) ----
        # h2[t] = h1[2t-1]@W2_0 + h1[2t]@W2_1 + h1[2t+1]@W2_2 + h1[2t+2]@W2_3
        acc2 = (jnp.dot(h1e, w2_1, preferred_element_type=f32)
                + jnp.dot(h1o, w2_2, preferred_element_type=f32)
                + jnp.dot(h1o_ref[b, 0:T2, :], w2_0, preferred_element_type=f32)      # h1[2t-1]
                + jnp.dot(h1e_ref[b, 1:T2 + 1, :], w2_3, preferred_element_type=f32))  # h1[2t+2]
        h2 = lrelu(acc2 + b2).astype(bf16)

        # ---- Linear(O->O) ----
        y = jnp.dot(h2, w3, preferred_element_type=f32) + b3
        o_ref[b, :, :] = y.astype(o_ref.dtype)


# ------------------------------- Wrapper --------------------------------------
def prepare_params(w1, b1, w2, b2, w3, b3, compute_dtype=jnp.bfloat16):
    """One-time relayout/cast of PyTorch-layout params (done once, not per forward).

    w1: (H, C, 4), w2: (O, H, 4) Conv1d weights; w3: (O, O) Linear weight."""
    w1t = jnp.transpose(w1, (2, 1, 0))                         # (4, C, H) per-tap (in,out)
    C, H = w1t.shape[1], w1t.shape[2]
    w1_full = w1t.reshape(4 * C, H).astype(compute_dtype)      # taps 0..3 stacked on K
    w1_lo = w1t[0:2].reshape(2 * C, H).astype(compute_dtype)   # taps 0,1
    w1_hi = w1t[2:4].reshape(2 * C, H).astype(compute_dtype)   # taps 2,3
    w2t = jnp.transpose(w2, (2, 1, 0)).astype(compute_dtype)   # (4, H, O)
    w3t = w3.T.astype(compute_dtype)                           # (O_in, O_out)
    return (w1_full, w1_lo, w1_hi, b1.reshape(1, -1).astype(jnp.float32),
            w2t, b2.reshape(1, -1).astype(jnp.float32),
            w3t, b3.reshape(1, -1).astype(jnp.float32))


def _pick_batch_block(B, max_bb=8):
    """Largest divisor of B <= max_bb that still leaves >= 2 grid steps when B >= 2
    (keeps both v7x TensorCores busy while amortizing per-step overhead)."""
    cap = max(1, min(max_bb, B // 2 if B >= 2 else 1))
    for bb in range(cap, 0, -1):
        if B % bb == 0:
            return bb
    return 1


def movement_conv_encoder(x, w1_full, w1_lo, w1_hi, b1, w2t, b2, w3t, b3):
    """x: (B, T, input_size) channels-last -> (B, T//4, output_size)."""
    B, T, C = x.shape
    assert T % 4 == 0, "this kernel assumes the sequence length is a multiple of 4"
    H = w1_full.shape[-1]
    O = w2t.shape[-1]
    T2 = T // 4
    BB = _pick_batch_block(B)
    cdt = w1_full.dtype

    # Fold the +-1 conv halo and the 4 stride-2 taps into the layout: pad (+1 front,
    # +3 back), cast to the MXU dtype, free row-major reshape to (B, T/4+1, 4C).
    # Pad + cast fuse into one XLA op, so the pad adds no extra HBM pass over x; the
    # two trailing pad rows are never read by the kernel.
    xq = jnp.pad(x, ((0, 0), (1, 3), (0, 0))).astype(cdt).reshape(B, T2 + 1, 4 * C)

    w_isize = jnp.dtype(cdt).itemsize
    out_isize = jnp.dtype(x.dtype).itemsize
    flops = 2 * B * T2 * (8 * C * H + 4 * H * O + O * O)
    weight_bytes = (8 * C * H + 4 * H * O + O * O) * w_isize + (H + 2 * O) * 4
    bytes_accessed = (B * (T2 + 1) * 4 * C * w_isize      # xq
                      + B * T2 * O * out_isize            # y
                      + weight_bytes)

    # Size-aware VMEM budget (double-buffered x/y blocks + resident weights + scratch),
    # capped at 48 MiB so it is safe on v7x's 64 MiB VMEM (v5e/v6e have 128 MiB).
    x_blk = BB * (T2 + 1) * 4 * C * w_isize
    o_blk = BB * T2 * O * out_isize
    scratch_bytes = 2 * BB * (T2 + 1) * H * 2
    vmem_limit = int(max(8 << 20,
                         min(48 << 20,
                             2 * (x_blk + o_blk + weight_bytes) + scratch_bytes + (4 << 20))))

    kernel = functools.partial(_encoder_kernel, C=C, T2=T2, BB=BB, neg_slope=0.2)
    return pl.pallas_call(
        kernel,
        out_shape=jax.ShapeDtypeStruct((B, T2, O), x.dtype),
        grid_spec=pltpu.PrefetchScalarGridSpec(
            num_scalar_prefetch=0,
            grid=(B // BB,),
            in_specs=[
                pl.BlockSpec((BB, T2 + 1, 4 * C), lambda g: (g, 0, 0)),  # x: BB rows / step
                pl.BlockSpec((4 * C, H), lambda g: (0, 0)),              # weights: resident
                pl.BlockSpec((2 * C, H), lambda g: (0, 0)),
                pl.BlockSpec((2 * C, H), lambda g: (0, 0)),
                pl.BlockSpec((1, H), lambda g: (0, 0)),
                pl.BlockSpec((4, H, O), lambda g: (0, 0, 0)),
                pl.BlockSpec((1, O), lambda g: (0, 0)),
                pl.BlockSpec((O, O), lambda g: (0, 0)),
                pl.BlockSpec((1, O), lambda g: (0, 0)),
            ],
            out_specs=pl.BlockSpec((BB, T2, O), lambda g: (g, 0, 0)),
            scratch_shapes=[pltpu.VMEM((BB, T2 + 1, H), jnp.bfloat16),   # odd plane + halo
                            pltpu.VMEM((BB, T2 + 1, H), jnp.bfloat16)],  # even plane + halo
        ),
        compiler_params=pltpu.CompilerParams(
            dimension_semantics=("parallel",),
            vmem_limit_bytes=vmem_limit,
        ),
        cost_estimate=pl.CostEstimate(
            flops=flops, transcendentals=0, bytes_accessed=bytes_accessed),
    )(xq, w1_full, w1_lo, w1_hi, b1, w2t, b2, w3t, b3)


# --------------------------- Plain-JAX reference ------------------------------
def _reference(x, w1, b1, w2, b2, w3, b3):
    """XLA reference matching the PyTorch module (validation only)."""
    def conv(h, w, b):  # h: (B, T, C) channels-last, w: (O, C, 4) PyTorch layout
        B, T, C = h.shape
        O = w.shape[0]
        hp = jnp.pad(h, ((0, 0), (1, 1), (0, 0)))
        To = T // 2
        idx = jnp.arange(To)[:, None] * 2 + jnp.arange(4)[None, :]
        patches = hp[:, idx, :].reshape(B, To, 4 * C)              # [k, c] ordering
        wk = jnp.transpose(w, (2, 1, 0)).reshape(4 * C, O)
        return jnp.einsum('btk,ko->bto', patches, wk) + b
    lrelu = lambda v: jnp.where(v >= 0, v, 0.2 * v)
    h1 = lrelu(conv(x, w1, b1))
    h2 = lrelu(conv(h1, w2, b2))
    return h2 @ w3.T + b3


# --------------------------- Deterministic demo --------------------------------
def xavier_normal(key, shape, fan_in, fan_out):
    std = (2.0 / (fan_in + fan_out)) ** 0.5
    return std * jax.random.normal(key, shape, dtype=jnp.float32)


if __name__ == "__main__":
    B, T = 2, 16
    input_size, hidden_size, output_size = 4, 32, 16

    key = jax.random.PRNGKey(0)
    k1, k2, k3, kx = jax.random.split(key, 4)

    # PyTorch-layout params: Conv1d weight (out, in, K), Linear weight (out, in), zero bias.
    w1 = xavier_normal(k1, (hidden_size, input_size, 4), input_size * 4, hidden_size * 4)
    b1 = jnp.zeros((hidden_size,), jnp.float32)
    w2 = xavier_normal(k2, (output_size, hidden_size, 4), hidden_size * 4, output_size * 4)
    b2 = jnp.zeros((output_size,), jnp.float32)
    w3 = xavier_normal(k3, (output_size, output_size), output_size, output_size)
    b3 = jnp.zeros((output_size,), jnp.float32)

    x = jax.random.normal(kx, (B, T, input_size), dtype=jnp.float32)

    params = prepare_params(w1, b1, w2, b2, w3, b3)   # one-time weight relayout + bf16 cast
    encoder = jax.jit(movement_conv_encoder)

    out = jax.block_until_ready(encoder(x, *params))
    assert out.shape == (B, T // 4, output_size), out.shape

    ref = _reference(x, w1, b1, w2, b2, w3, b3)
    err = float(jnp.max(jnp.abs(out - ref)))
    assert err < 5e-2, f"max abs err vs reference: {err}"

    print("KERNEL_OK")
</pallas_src>

<mosaic_0001>
module attributes {stable_mosaic.version = 11 : i64} {
  func.func @_encoder_kernel(%arg0: i32, %arg1: memref<1x5x16xbf16, #tpu.memory_space<vmem>>, %arg2: memref<16x32xbf16, #tpu.memory_space<vmem>>, %arg3: memref<8x32xbf16, #tpu.memory_space<vmem>>, %arg4: memref<8x32xbf16, #tpu.memory_space<vmem>>, %arg5: memref<1x32xf32, #tpu.memory_space<vmem>>, %arg6: memref<4x32x16xbf16, #tpu.memory_space<vmem>>, %arg7: memref<1x16xf32, #tpu.memory_space<vmem>>, %arg8: memref<16x16xbf16, #tpu.memory_space<vmem>>, %arg9: memref<1x16xf32, #tpu.memory_space<vmem>>, %arg10: memref<1x4x16xf32, #tpu.memory_space<vmem>>, %arg11: memref<1x5x32xbf16, #tpu.memory_space<vmem>>, %arg12: memref<1x5x32xbf16, #tpu.memory_space<vmem>>) attributes {dimension_semantics = [#tpu.dimension_semantics<parallel>], iteration_bounds = array<i64: 2>, scalar_prefetch = 0 : i64, scratch_operands = 2 : i64, tpu.core_type = #tpu.core_type<tc>, window_params = [{transform_indices = @transform_0, window_bounds = array<i64: 1, 5, 16>}, {pipeline_mode = #tpu.pipeline_mode<synchronous>, transform_indices = @transform_1, window_bounds = array<i64: 16, 32>}, {pipeline_mode = #tpu.pipeline_mode<synchronous>, transform_indices = @transform_2, window_bounds = array<i64: 8, 32>}, {pipeline_mode = #tpu.pipeline_mode<synchronous>, transform_indices = @transform_3, window_bounds = array<i64: 8, 32>}, {pipeline_mode = #tpu.pipeline_mode<synchronous>, transform_indices = @transform_4, window_bounds = array<i64: 1, 32>}, {pipeline_mode = #tpu.pipeline_mode<synchronous>, transform_indices = @transform_5, window_bounds = array<i64: 4, 32, 16>}, {pipeline_mode = #tpu.pipeline_mode<synchronous>, transform_indices = @transform_6, window_bounds = array<i64: 1, 16>}, {pipeline_mode = #tpu.pipeline_mode<synchronous>, transform_indices = @transform_7, window_bounds = array<i64: 16, 16>}, {pipeline_mode = #tpu.pipeline_mode<synchronous>, transform_indices = @transform_8, window_bounds = array<i64: 1, 16>}, {transform_indices = @transform_9, window_bounds = array<i64: 1, 4, 16>}]} {
    %c0 = arith.constant 0 : index
    %c0_0 = arith.constant 0 : index
    %0 = vector.load %arg2[%c0, %c0_0] : memref<16x32xbf16, #tpu.memory_space<vmem>>, vector<16x32xbf16>
    %c0_1 = arith.constant 0 : index
    %c0_2 = arith.constant 0 : index
    %1 = vector.load %arg3[%c0_1, %c0_2] : memref<8x32xbf16, #tpu.memory_space<vmem>>, vector<8x32xbf16>
    %c0_3 = arith.constant 0 : index
    %c0_4 = arith.constant 0 : index
    %2 = vector.load %arg4[%c0_3, %c0_4] : memref<8x32xbf16, #tpu.memory_space<vmem>>, vector<8x32xbf16>
    %c0_5 = arith.constant 0 : index
    %c0_6 = arith.constant 0 : index
    %c0_7 = arith.constant 0 : index
    %3 = vector.load %arg6[%c0_5, %c0_6, %c0_7] : memref<4x32x16xbf16, #tpu.memory_space<vmem>>, vector<1x32x16xbf16>
    %4 = vector.shape_cast %3 : vector<1x32x16xbf16> to vector<32x16xbf16>
    %c1 = arith.constant 1 : index
    %c0_8 = arith.constant 0 : index
    %c0_9 = arith.constant 0 : index
    %5 = vector.load %arg6[%c1, %c0_8, %c0_9] : memref<4x32x16xbf16, #tpu.memory_space<vmem>>, vector<1x32x16xbf16>
    %6 = vector.shape_cast %5 : vector<1x32x16xbf16> to vector<32x16xbf16>
    %c2 = arith.constant 2 : index
    %c0_10 = arith.constant 0 : index
    %c0_11 = arith.constant 0 : index
    %7 = vector.load %arg6[%c2, %c0_10, %c0_11] : memref<4x32x16xbf16, #tpu.memory_space<vmem>>, vector<1x32x16xbf16>
    %8 = vector.shape_cast %7 : vector<1x32x16xbf16> to vector<32x16xbf16>
    %c3 = arith.constant 3 : index
    %c0_12 = arith.constant 0 : index
    %c0_13 = arith.constant 0 : index
    %9 = vector.load %arg6[%c3, %c0_12, %c0_13] : memref<4x32x16xbf16, #tpu.memory_space<vmem>>, vector<1x32x16xbf16>
    %10 = vector.shape_cast %9 : vector<1x32x16xbf16> to vector<32x16xbf16>
    %c0_14 = arith.constant 0 : index
    %c0_15 = arith.constant 0 : index
    %11 = vector.load %arg8[%c0_14, %c0_15] : memref<16x16xbf16, #tpu.memory_space<vmem>>, vector<16x16xbf16>
    %c0_16 = arith.constant 0 : index
    %c0_17 = arith.constant 0 : index
    %12 = vector.load %arg5[%c0_16, %c0_17] : memref<1x32xf32, #tpu.memory_space<vmem>>, vector<1x32xf32>
    %c0_18 = arith.constant 0 : index
    %c0_19 = arith.constant 0 : index
    %13 = vector.load %arg7[%c0_18, %c0_19] : memref<1x16xf32, #tpu.memory_space<vmem>>, vector<1x16xf32>
    %c0_20 = arith.constant 0 : index
    %c0_21 = arith.constant 0 : index
    %14 = vector.load %arg9[%c0_20, %c0_21] : memref<1x16xf32, #tpu.memory_space<vmem>>, vector<1x16xf32>
    %cst = arith.constant 0.000000e+00 : bf16
    %15 = vector.broadcast %cst : bf16 to vector<1x32xbf16>
    %c0_22 = arith.constant 0 : index
    %c0_23 = arith.constant 0 : index
    %c0_24 = arith.constant 0 : index
    %16 = vector.load %arg1[%c0_22, %c0_23, %c0_24] : memref<1x5x16xbf16, #tpu.memory_space<vmem>>, vector<1x4x16xbf16>
    %17 = vector.shape_cast %16 : vector<1x4x16xbf16> to vector<4x16xbf16>
    %cst_25 = arith.constant dense<0.000000e+00> : vector<4x32xf32>
    %18 = tpu.matmul %17, %0, %cst_25 {dimension_numbers = #tpu.dot_dimension_numbers<[1], [0], [0], [1], [0, 0, 1, 1], [], []>} : vector<4x16xbf16>, vector<16x32xbf16>, vector<4x32xf32> -> vector<4x32xf32>
    %c0_26 = arith.constant 0 : index
    %c0_27 = arith.constant 0 : index
    %c8 = arith.constant 8 : index
    %19 = vector.load %arg1[%c0_26, %c0_27, %c8] : memref<1x5x16xbf16, #tpu.memory_space<vmem>>, vector<1x4x8xbf16>
    %20 = vector.shape_cast %19 : vector<1x4x8xbf16> to vector<4x8xbf16>
    %cst_28 = arith.constant dense<0.000000e+00> : vector<4x32xf32>
    %21 = tpu.matmul %20, %1, %cst_28 {dimension_numbers = #tpu.dot_dimension_numbers<[1], [0], [0], [1], [0, 0, 1, 1], [], []>} : vector<4x8xbf16>, vector<8x32xbf16>, vector<4x32xf32> -> vector<4x32xf32>
    %c0_29 = arith.constant 0 : index
    %c1_30 = arith.constant 1 : index
    %c0_31 = arith.constant 0 : index
    %22 = vector.load %arg1[%c0_29, %c1_30, %c0_31] : memref<1x5x16xbf16, #tpu.memory_space<vmem>>, vector<1x4x8xbf16>
    %23 = vector.shape_cast %22 : vector<1x4x8xbf16> to vector<4x8xbf16>
    %cst_32 = arith.constant dense<0.000000e+00> : vector<4x32xf32>
    %24 = tpu.matmul %23, %2, %cst_32 {dimension_numbers = #tpu.dot_dimension_numbers<[1], [0], [0], [1], [0, 0, 1, 1], [], []>} : vector<4x8xbf16>, vector<8x32xbf16>, vector<4x32xf32> -> vector<4x32xf32>
    %25 = arith.addf %21, %24 : vector<4x32xf32>
    %26 = vector.broadcast %12 : vector<1x32xf32> to vector<4x32xf32>
    %27 = arith.addf %18, %26 : vector<4x32xf32>
    %cst_33 = arith.constant 2.000000e-01 : f32
    %28 = vector.broadcast %cst_33 : f32 to vector<4x32xf32>
    %29 = arith.mulf %28, %27 : vector<4x32xf32>
    %30 = arith.maximumf %27, %29 : vector<4x32xf32>
    %31 = arith.truncf %30 : vector<4x32xf32> to vector<4x32xbf16>
    %32 = vector.broadcast %12 : vector<1x32xf32> to vector<4x32xf32>
    %33 = arith.addf %25, %32 : vector<4x32xf32>
    %cst_34 = arith.constant 2.000000e-01 : f32
    %34 = vector.broadcast %cst_34 : f32 to vector<4x32xf32>
    %35 = arith.mulf %34, %33 : vector<4x32xf32>
    %36 = arith.maximumf %33, %35 : vector<4x32xf32>
    %37 = arith.truncf %36 : vector<4x32xf32> to vector<4x32xbf16>
    %c0_35 = arith.constant 0 : index
    %c0_36 = arith.constant 0 : index
    %c0_37 = arith.constant 0 : index
    %38 = vector.load %arg11[%c0_35, %c0_36, %c0_37] : memref<1x5x32xbf16, #tpu.memory_space<vmem>>, vector<1x1x32xbf16>
    %39 = vector.shape_cast %38 : vector<1x1x32xbf16> to vector<1x32xbf16>
    %40 = vector.shape_cast %15 : vector<1x32xbf16> to vector<1x1x32xbf16>
    tpu.vector_store %arg11[%c0_35, %c0_36, %c0_37], %40 {strides = array<i32>} : memref<1x5x32xbf16, #tpu.memory_space<vmem>>, vector<1x1x32xbf16>,
    %c0_38 = arith.constant 0 : index
    %c1_39 = arith.constant 1 : index
    %c0_40 = arith.constant 0 : index
    %41 = vector.load %arg11[%c0_38, %c1_39, %c0_40] : memref<1x5x32xbf16, #tpu.memory_space<vmem>>, vector<1x4x32xbf16>
    %42 = vector.shape_cast %41 : vector<1x4x32xbf16> to vector<4x32xbf16>
    %43 = vector.shape_cast %37 : vector<4x32xbf16> to vector<1x4x32xbf16>
    tpu.vector_store %arg11[%c0_38, %c1_39, %c0_40], %43 {strides = array<i32>} : memref<1x5x32xbf16, #tpu.memory_space<vmem>>, vector<1x4x32xbf16>,
    %c0_41 = arith.constant 0 : index
    %c0_42 = arith.constant 0 : index
    %c0_43 = arith.constant 0 : index
    %44 = vector.load %arg12[%c0_41, %c0_42, %c0_43] : memref<1x5x32xbf16, #tpu.memory_space<vmem>>, vector<1x4x32xbf16>
    %45 = vector.shape_cast %44 : vector<1x4x32xbf16> to vector<4x32xbf16>
    %46 = vector.shape_cast %31 : vector<4x32xbf16> to vector<1x4x32xbf16>
    tpu.vector_store %arg12[%c0_41, %c0_42, %c0_43], %46 {strides = array<i32>} : memref<1x5x32xbf16, #tpu.memory_space<vmem>>, vector<1x4x32xbf16>,
    %c0_44 = arith.constant 0 : index
    %c4 = arith.constant 4 : index
    %c0_45 = arith.constant 0 : index
    %47 = vector.load %arg12[%c0_44, %c4, %c0_45] : memref<1x5x32xbf16, #tpu.memory_space<vmem>>, vector<1x1x32xbf16>
    %48 = vector.shape_cast %47 : vector<1x1x32xbf16> to vector<1x32xbf16>
    %49 = vector.shape_cast %15 : vector<1x32xbf16> to vector<1x1x32xbf16>
    tpu.vector_store %arg12[%c0_44, %c4, %c0_45], %49 {strides = array<i32>} : memref<1x5x32xbf16, #tpu.memory_space<vmem>>, vector<1x1x32xbf16>,
    %cst_46 = arith.constant dense<0.000000e+00> : vector<4x16xf32>
    %50 = tpu.matmul %31, %6, %cst_46 {dimension_numbers = #tpu.dot_dimension_numbers<[1], [0], [0], [1], [0, 0, 1, 1], [], []>} : vector<4x32xbf16>, vector<32x16xbf16>, vector<4x16xf32> -> vector<4x16xf32>
    %cst_47 = arith.constant dense<0.000000e+00> : vector<4x16xf32>
    %51 = tpu.matmul %37, %8, %cst_47 {dimension_numbers = #tpu.dot_dimension_numbers<[1], [0], [0], [1], [0, 0, 1, 1], [], []>} : vector<4x32xbf16>, vector<32x16xbf16>, vector<4x16xf32> -> vector<4x16xf32>
    %52 = arith.addf %50, %51 : vector<4x16xf32>
    %c0_48 = arith.constant 0 : index
    %c0_49 = arith.constant 0 : index
    %c0_50 = arith.constant 0 : index
    %53 = vector.load %arg11[%c0_48, %c0_49, %c0_50] : memref<1x5x32xbf16, #tpu.memory_space<vmem>>, vector<1x4x32xbf16>
    %54 = vector.shape_cast %53 : vector<1x4x32xbf16> to vector<4x32xbf16>
    %cst_51 = arith.constant dense<0.000000e+00> : vector<4x16xf32>
    %55 = tpu.matmul %54, %4, %cst_51 {dimension_numbers = #tpu.dot_dimension_numbers<[1], [0], [0], [1], [0, 0, 1, 1], [], []>} : vector<4x32xbf16>, vector<32x16xbf16>, vector<4x16xf32> -> vector<4x16xf32>
    %56 = arith.addf %52, %55 : vector<4x16xf32>
    %c0_52 = arith.constant 0 : index
    %c1_53 = arith.constant 1 : index
    %c0_54 = arith.constant 0 : index
    %57 = vector.load %arg12[%c0_52, %c1_53, %c0_54] : memref<1x5x32xbf16, #tpu.memory_space<vmem>>, vector<1x4x32xbf16>
    %58 = vector.shape_cast %57 : vector<1x4x32xbf16> to vector<4x32xbf16>
    %cst_55 = arith.constant dense<0.000000e+00> : vector<4x16xf32>
    %59 = tpu.matmul %58, %10, %cst_55 {dimension_numbers = #tpu.dot_dimension_numbers<[1], [0], [0], [1], [0, 0, 1, 1], [], []>} : vector<4x32xbf16>, vector<32x16xbf16>, vector<4x16xf32> -> vector<4x16xf32>
    %60 = arith.addf %56, %59 : vector<4x16xf32>
    %61 = vector.broadcast %13 : vector<1x16xf32> to vector<4x16xf32>
    %62 = arith.addf %60, %61 : vector<4x16xf32>
    %cst_56 = arith.constant 2.000000e-01 : f32
    %63 = vector.broadcast %cst_56 : f32 to vector<4x16xf32>
    %64 = arith.mulf %63, %62 : vector<4x16xf32>
    %65 = arith.maximumf %62, %64 : vector<4x16xf32>
    %66 = arith.truncf %65 : vector<4x16xf32> to vector<4x16xbf16>
    %cst_57 = arith.constant dense<0.000000e+00> : vector<4x16xf32>
    %67 = tpu.matmul %66, %11, %cst_57 {dimension_numbers = #tpu.dot_dimension_numbers<[1], [0], [0], [1], [0, 0, 1, 1], [], []>} : vector<4x16xbf16>, vector<16x16xbf16>, vector<4x16xf32> -> vector<4x16xf32>
    %68 = vector.broadcast %14 : vector<1x16xf32> to vector<4x16xf32>
    %69 = arith.addf %67, %68 : vector<4x16xf32>
    %c0_58 = arith.constant 0 : index
    %c0_59 = arith.constant 0 : index
    %c0_60 = arith.constant 0 : index
    %70 = vector.load %arg10[%c0_58, %c0_59, %c0_60] : memref<1x4x16xf32, #tpu.memory_space<vmem>>, vector<1x4x16xf32>
    %71 = vector.shape_cast %70 : vector<1x4x16xf32> to vector<4x16xf32>
    %72 = vector.shape_cast %69 : vector<4x16xf32> to vector<1x4x16xf32>
    tpu.vector_store %arg10[%c0_58, %c0_59, %c0_60], %72 {strides = array<i32>} : memref<1x4x16xf32, #tpu.memory_space<vmem>>, vector<1x4x16xf32>,
    return
  }
  func.func @transform_0(%arg0: i32) -> (i32, i32, i32) {
    %c0_i32 = arith.constant 0 : i32
    %c0_i32_0 = arith.constant 0 : i32
    %c0_i32_1 = arith.constant 0 : i32
    return %arg0, %c0_i32, %c0_i32_0 : i32, i32, i32
  }
  func.func @transform_1(%arg0: i32) -> (i32, i32) {
    %c0_i32 = arith.constant 0 : i32
    %c0_i32_0 = arith.constant 0 : i32
    %c0_i32_1 = arith.constant 0 : i32
    return %c0_i32, %c0_i32_0 : i32, i32
  }
  func.func @transform_2(%arg0: i32) -> (i32, i32) {
    %c0_i32 = arith.constant 0 : i32
    %c0_i32_0 = arith.constant 0 : i32
    %c0_i32_1 = arith.constant 0 : i32
    return %c0_i32, %c0_i32_0 : i32, i32
  }
  func.func @transform_3(%arg0: i32) -> (i32, i32) {
    %c0_i32 = arith.constant 0 : i32
    %c0_i32_0 = arith.constant 0 : i32
    %c0_i32_1 = arith.constant 0 : i32
    return %c0_i32, %c0_i32_0 : i32, i32
  }
  func.func @transform_4(%arg0: i32) -> (i32, i32) {
    %c0_i32 = arith.constant 0 : i32
    %c0_i32_0 = arith.constant 0 : i32
    %c0_i32_1 = arith.constant 0 : i32
    return %c0_i32, %c0_i32_0 : i32, i32
  }
  func.func @transform_5(%arg0: i32) -> (i32, i32, i32) {
    %c0_i32 = arith.constant 0 : i32
    %c0_i32_0 = arith.constant 0 : i32
    %c0_i32_1 = arith.constant 0 : i32
    %c0_i32_2 = arith.constant 0 : i32
    return %c0_i32, %c0_i32_0, %c0_i32_1 : i32, i32, i32
  }
  func.func @transform_6(%arg0: i32) -> (i32, i32) {
    %c0_i32 = arith.constant 0 : i32
    %c0_i32_0 = arith.constant 0 : i32
    %c0_i32_1 = arith.constant 0 : i32
    return %c0_i32, %c0_i32_0 : i32, i32
  }
  func.func @transform_7(%arg0: i32) -> (i32, i32) {
    %c0_i32 = arith.constant 0 : i32
    %c0_i32_0 = arith.constant 0 : i32
    %c0_i32_1 = arith.constant 0 : i32
    return %c0_i32, %c0_i32_0 : i32, i32
  }
  func.func @transform_8(%arg0: i32) -> (i32, i32) {
    %c0_i32 = arith.constant 0 : i32
    %c0_i32_0 = arith.constant 0 : i32
    %c0_i32_1 = arith.constant 0 : i32
    return %c0_i32, %c0_i32_0 : i32, i32
  }
  func.func @transform_9(%arg0: i32) -> (i32, i32, i32) {
    %c0_i32 = arith.constant 0 : i32
    %c0_i32_0 = arith.constant 0 : i32
    %c0_i32_1 = arith.constant 0 : i32
    return %arg0, %c0_i32, %c0_i32_0 : i32, i32, i32
  }
}

</mosaic_0001>

<bundles_post_ra>
// kernel: movement_conv_encoder.1
= control target key start
LH: loop header
LB: loop body
LE: loop exit
PB: predicated region body
PF: predicated region fallthrough
CT: control target
= control target key end

     0   :  { %14 = vsyncpa [#allocation5], 0  ;;  %s1413_s0 = inlined_call_operand.vmem [shape: bf16[2,5,16], index: 0, kind: input, shape index: {}]   ;;  %s1414_s1 = inlined_call_operand.vmem [shape: bf16[16,32], index: 1, kind: input, shape index: {}]   ;;  %s1415_s2 = inlined_call_operand.vmem [shape: bf16[8,32], index: 2, kind: input, shape index: {}]   ;;  %s1416_s3 = inlined_call_operand.vmem [shape: bf16[8,32], index: 3, kind: input, shape index: {}]   ;;  %s1417_s4 = inlined_call_operand.vmem [shape: f32[1,32], index: 4, kind: input, shape index: {}]   ;;  %s1418_s5 = inlined_call_operand.vmem [shape: bf16[4,32,16], index: 5, kind: input, shape index: {}]   ;;  %s1419_s6 = inlined_call_operand.vmem [shape: f32[1,16], index: 6, kind: input, shape index: {}]   ;;  %s1420_s7 = inlined_call_operand.vmem [shape: bf16[16,16], index: 7, kind: input, shape index: {}]   ;;  %s1421_s8 = inlined_call_operand.vmem [shape: f32[1,16], index: 8, kind: input, shape index: {}]   ;;  %s1422_s9 = inlined_call_operand.hbm [shape: f32[2,4,16], index: 9, kind: output, shape index: {}]  }
   0x1   :  { %16 = vsyncpa [#allocation5 + $0x1], 0  ;;  %s1234_s30 = smov 0   ;;  %s1236_s10 = smov 0  }
   0x2   :  { %s1238_s11 = smov 0   ;;  %s1240_s12 = smov 0  }
   0x3 LB: > { %s1255_s13 = sadd.s32 4294967295, %s1178_s12   ;;  %s937_s14 = sadd.s32 4294967294, %s1178_s12   ;;  %s1178_s12 = sphi %s1240_s12, %s1428_s12   ;;  %s1174_s11 = sphi %s1238_s11, %s1427_s11   ;;  %s1170_s10 = sphi %s1236_s10, %s1426_s10   ;;  %s1166_s30 = sphi %s1234_s30, %s1425_s30  }
   0x4   : > { %s1259_s15 = sadd.s32 1, %s1178_s12   ;;  %s223_s16 = sadd.s32 1, %s1174_s11 }
   0x5   : > { %s220_s17 = ssub.s32 %s1178_s12, %s1259_s15  ;;  %p233_p0 = scmp.ne.s32.totalorder %s1174_s11, %s1170_s10 }
   0x6   : > { %p221_p1 = scmp.eq.s32.totalorder %s220_s17, 0  ;;  %p234_p2 = scmp.eq.s32.totalorder %s1255_s13, 1 }
   0x7   : > { %p239_p3 = scmp.ne.s32.totalorder %s1170_s10, %s1166_s30  ;;  %p240_p4 = scmp.eq.s32.totalorder %s937_s14, 1 }
   0x8   : > { %s1270_s18 = scalar_select %p221_p1, %s1174_s11, %s223_s16  }
   0x9   : > { %p1272_p5 = por %p234_p2, %p233_p0  ;;  %p1276_p6 = por %p240_p4, %p239_p3 }
   0xa   : > { %p940_p7 = scmp.ge.s32.totalorder %s1178_s12, 1  ;;  %p289_p8 = scmp.lt.s32.totalorder %s1178_s12, 3 }
   0xc   : > { %p290_p9 = pnand %p940_p7, %p289_p8 }
   0xd   : > { %p324_p10 = scmp.lt.s32.totalorder (!%p290_p9), %s1255_s13, 1  ;;  %v332_v0 = vld [vmem:[%s1416_s3] sm:$0xf] (!%p290_p9)  ;;  %vm373_vm0 = vcmask (!%p290_p9), 1043456   ;;  %v1180_v1 = vmov (!%p290_p9), 0.0   ;;  %vm1181_vm1 = vmmov (!%p290_p9), 0  }
   0xe   : > { %293 = sbr.rel (%p290_p9) target bundleno = 832 (0x340), region = 56  ;;  %1005 = vmatprep.subr.bf16.mxu0 (!%p290_p9), %v1180_v1  ;;  %v375_v2 = vsel (!%p290_p9), %vm373_vm0, %v332_v0, 0  ;;  %1011 = vmatprep.subr.bf16.mxu1 (!%p290_p9), %v1180_v1  ;;  %v331_v3 = vld [vmem:[%s1415_s2] sm:$0xf] (!%p290_p9)  ;;  %s1182_s14 = smov (!%p290_p9), 120   ;;  %vm369_vm2 = vcmask (!%p290_p9), 64512  }
   0xf   : > { %1006 = vmatpush3.bf16.msra.mxu0 (!%p290_p9), %v375_v2  ;;  %1007 = vmatprep.mubr.msk.bf16.mxu0 (!%p290_p9), %vm1181_vm1, %v1180_v1  ;;  %v426_v4 = vsel (!%p290_p9), %vm373_vm0, %v331_v3, 0  ;;  %v1105_v11 = vld [vmem:[%s1414_s1] sm:$0xff] (!%p290_p9)   ;;  %vm480_vm3 = vcmask (!%p290_p9), 130048   ;;  %v1106_v14 = vld [vmem:[%s1418_s5 + $0x10] sm:$0xff] (!%p290_p9)   ;;  %v1108_v16 = vld [vmem:[%s1418_s5 + $0x18] sm:$0xff] (!%p290_p9)   ;;  %vm556_vm4 = vcmask (!%p290_p9), 256002  }
  0x10   : > { %1017 = vmatprep.subr.bf16.mxu0 (!%p290_p9), %v1180_v1  ;;  %1013 = vmatprep.mubr.msk.bf16.mxu1 (!%p290_p9), %vm1181_vm1, %v1180_v1  ;;  %v1107_v15 = vld [vmem:[%s1418_s5 + $0x20] sm:$0xff] (!%p290_p9)   ;;  %vm557_vm5 = vsmask.f32 (!%p290_p9), 2304  ;;  %vm531_vm7 = vcmask (!%p290_p9), 253952   ;;  %vm532_vm8 = vsmask.f32 (!%p290_p9), 256 }
  0x11   : > { %1012 = vmatpush3.bf16.msra.mxu1 (!%p290_p9), %v426_v4  ;;  %vm558_vm6 = vmand (!%p290_p9), %vm556_vm4, %vm557_vm5  ;;  %v559_v17 = vld [vmem:[#allocation3] sm:$0x4] (!%p290_p9)  ;;  %v1109_v19 = vld [vmem:[%s1418_s5 + $0x28] sm:$0xff] (!%p290_p9)   ;;  %vm554_vm10 = vcmask (!%p290_p9), 254976   ;;  %vm574_vm11 = vcmask (!%p290_p9), 261120   ;;  %vm548_vm12 = vcmask (!%p290_p9), 256000  }
  0x12   : > { %1023 = vmatprep.subr.bf16.mxu1 (!%p290_p9), %v1180_v1  ;;  %v560_v18 = vsel (!%p290_p9), %vm558_vm6, 0, %v559_v17  ;;  %vm533_vm9 = vmand (!%p290_p9), %vm531_vm7, %vm532_vm8  ;;  %v534_v20 = vld [vmem:[#allocation2] sm:$0x1] (!%p290_p9)  ;;  %v1110_v34 = vld [vmem:[%s1418_s5 + $0x30] sm:$0xff] (!%p290_p9)   ;;  %vm549_vm13 = vsmask.f32 (!%p290_p9), 2306 }
  0x13   : > { %561 = vst [vmem:[#allocation3] sm:$0x4] (!%p290_p9), %v560_v18  ;;  %v535_v21 = vsel (!%p290_p9), %vm533_vm9, 0, %v534_v20  ;;  %v959_v26 = vld [vmem:[%s1417_s4] ss:$0 sm:$0xff] (!%p290_p9)  ;;  %v1112_v36 = vld [vmem:[%s1418_s5 + $0x38] sm:$0xff] (!%p290_p9)   ;;  %vm550_vm14 = vmand (!%p290_p9), %vm548_vm12, %vm549_vm13 }
  0x14   : > { %536 = vst [vmem:[#allocation2] sm:$0x1] (!%p290_p9), %v535_v21  ;;  %v1111_v50 = vld [vmem:[%s1418_s5] sm:$0xff] (!%p290_p9)   ;;  %v1114_v53 = vld [vmem:[%s1418_s5 + $0x8] sm:$0xff] (!%p290_p9)   ;;  %s321_s16 = sand.u32 (!%p290_p9), 1, %s1170_s10   ;;  %vm862_vm15 = vcmask (!%p290_p9), 125952  }
  0x15   : > { %s325_s23 = scalar_select %p324_p10, %s1255_s13, 1  ;;  %v1115_v60 = vld [vmem:[%s1420_s7] sm:$0xff]  }
  0x16   : > { %s941_s17 = sshll.u32 %s321_s16, 2  ;;  %v977_v21 = vld [vmem:[%s1421_s8] ss:$0 sm:$0xff] }
  0x17   : > { %s942_s26 = sshll.u32 %s325_s23, 2  ;;  %s981_s23 = sshll.u32 %s1255_s13, 6 }
  0x18   : > { %s327_s29 = scalar_lea.vmem %s1413_s0, %s942_s26  ;;  %s323_s24 = scalar_lea.vmem [#allocation4], %s941_s17 }
  0x19   : > { %v357_v5 = vld [vmem:[%s327_s29] sm:$0x3]  ;;  %s878_s25 = sshll.u32 %s323_s24, 4  ;;  %s1371_s28 = scalar_lea.hbm %s1422_s9, %s981_s23  ;;  %s1373_s25 = int_to_ptr.vmem [resolvable:$true] %s878_s25 }
  0x1a   : > { %v1103_v6 = vld [vmem:[%s327_s29] ss:$0 sps:$4 sm:$0x77]   ;;  %v957_v7 = vcombine.low %v357_v5, %v357_v5  ;;  %s865_s13 = scalar_lea.sflag [#allocation5], %s321_s16  ;;  %s1116_s29 = scalar_lea.vmem %s1373_s25, 64 }
  0x1b   : > { %v363_v8 = vshrl.u32 %v1103_v6, 16  ;;  %v365_v9 = vshll.u32 %v1103_v6, 16  ;;  %v551_v56 = vld [vmem:[#allocation2] sm:$0x7]  ;;  %p1117_p11 = scmp.ne.s32.totalorder %s1373_s25, %s1116_s29 }
  0x1c   : > { %420 = vrot.lane.b32.xlu0 %v957_v7, %s1182_s14  ;;  %s1183_s14 = smov [#allocation4]  }
  0x1d   : > { %v367_v10 = vrot.slane %v365_v9, 1  ;;  %p1118_p12 = pnand %p1117_p11, %p1272_p5  ;;  %s1120_s17 = sshll.u32 %s1183_s14, 4  ;;  %s1121_s17 = int_to_ptr.vmem [resolvable:$false] %s1120_s17 }
  0x1e   : > { %s1122_s21 = scalar_lea.vmem %s1121_s17, 128  ;;  %p1123_p0 = scmp.lt.s32.totalorder %s1373_s25, %s1121_s17 }
  0x1f   : > { %v368_v12 = vor.u32 %v367_v10, %v363_v8  ;;  %p1119_p13 = pneg %p1118_p12  ;;  %p1124_p1 = scmp.lt.s32.totalorder %s1122_s21, %s1116_s29 }
  0x21   : > { %1008 = vmatmul.mubr.msk.bf16.vlgmr.msra.gmra.mrb[0].mxu0 %vm369_vm2, %v368_v12  ;;  %p1125_p2 = por %p1124_p1, %p1123_p0 }
  0x22   : > { %1018 = vmatpush3.bf16.msra.mxu0 %v1105_v11  ;;  %1019 = vmatprep.mubr.msk.bf16.mxu0 %vm1181_vm1, %v1180_v1 }
  0x23   : > { %1031 = vmatprep.subr.bf16.mxu0 %v1180_v1  ;;  %p1126_p3 = pnand %p1125_p2, %p1119_p13 }
  0x29   : > { %1020 = vmatmul.mubr.msk.bf16.vlgmr.msra.gmra.mrb[4].mxu0 %vm480_vm3, %v357_v5 }
  0x2a   : > { %1035 = vmatprep.mubr.msk.bf16.mxu0 %vm1181_vm1, %v1180_v1  ;;  %1032 = vmatpush3.bf16.msra.mxu0 %v1106_v14 }
  0x2b   : > { %1033 = vmatprep.subr.bf16.mxu0 %v1180_v1 }
  0x2e   : > { %1034 = vmatpush3.bf16.msra.mxu0 %v1108_v16 }
  0x2f   : > { %1047 = vmatprep.subr.bf16.mxu0 %v1180_v1 }
  0x8e   : > { %v421_v13 = vpop.permute.xlu0 %420 }
  0x8f   : > { %1014 = vmatmul.mubr.msk.bf16.vlgmr.msra.gmra.mrb[0].mxu1 %vm369_vm2, %v421_v13  ;;  %v976_v13 = vld [vmem:[%s1419_s6] ss:$0 sm:$0xff] }
  0x90   : > { %1027 = vmatprep.mubr.msk.bf16.mxu1 %vm1181_vm1, %v1180_v1  ;;  %1024 = vmatpush3.bf16.msra.mxu1 %v1107_v15 }
  0x91   : > { %1025 = vmatprep.subr.bf16.mxu1 %v1180_v1 }
  0x94   : > { %1026 = vmatpush3.bf16.msra.mxu1 %v1109_v19 }
  0x95   : > { %1039 = vmatprep.subr.bf16.mxu1 %v1180_v1 }
  0xf4   : > { %v411_v22 = vpop.f32.mrb[0].mxu0 }
  0xf5   : > { %v1009_v23 = vpop.f32.mrb[1].mxu0 }
  0xf6   : > { %v414_v24 = vpop.f32.mrb[2].mxu0 }
  0xf7   : > { %v1010_v25 = vpop.f32.mrb[3].mxu0 }
  0xfc   : > { %v518_v27 = vpop.f32.mrb[4].mxu0 }
  0xfd   : > { %v519_v28 = vadd.f32 %v959_v26, %v518_v27  ;;  %v1021_v29 = vpop.f32.mrb[5].mxu0 }
  0xfe   : > { %v521_v30 = vpop.f32.mrb[6].mxu0 }
  0xff   : > { %v524_v31 = vmul.f32 0.2, %v519_v28  ;;  %v1022_v32 = vpop.f32.mrb[7].mxu0 }
 0x101   : > { %v525_v33 = vmax.f32 %v519_v28, %v524_v31 }
 0x103   : > { %v526_v35 = vpack.c.bf16 %v525_v33, %v525_v33 }
 0x105   : > { %555 = vst.msk [vmem:[#allocation3] sm:$0x3] %vm554_vm10, %v526_v35  ;;  %1036 = vmatmul.mubr.msk.bf16.vlgmr.msra.gmra.mrb[8].mxu0 %vm574_vm11, %v526_v35 }
 0x106   : > { %1048 = vmatpush3.bf16.msra.mxu0 %v1110_v34  ;;  %1051 = vmatprep.mubr.msk.bf16.mxu0 %vm1181_vm1, %v1180_v1 }
 0x107   : > { %1049 = vmatprep.subr.bf16.mxu0 %v1180_v1 }
 0x10a   : > { %1050 = vmatpush3.bf16.msra.mxu0 %v1112_v36 }
 0x10c   : > { %v1113_v37 = vld [vmem:[#allocation3] ss:$0 sps:$4 sm:$0x77]  }
 0x10d   : > { %v735_v38 = vshrl.u32 %v1113_v37, 16  ;;  %v737_v39 = vshll.u32 %v1113_v37, 16 }
 0x10f   : > { %v739_v40 = vrot.slane %v737_v39, 1 }
 0x111   : > { %v740_v41 = vor.u32 %v739_v40, %v735_v38 }
 0x113   : > { %1052 = vmatmul.mubr.msk.bf16.vlgmr.msra.gmra.mrb[12].mxu0 %vm574_vm11, %v740_v41 }
 0x162   : > { %v462_v42 = vpop.f32.mrb[0].mxu1 }
 0x163   : > { %v463_v43 = vadd.f32 %v462_v42, %v411_v22  ;;  %v1015_v44 = vpop.f32.mrb[1].mxu1 }
 0x164   : > { %v465_v45 = vpop.f32.mrb[2].mxu1 }
 0x165   : > { %v527_v46 = vadd.f32 %v959_v26, %v463_v43  ;;  %v1016_v47 = vpop.f32.mrb[3].mxu1 }
 0x167   : > { %v528_v48 = vmul.f32 0.2, %v527_v46 }
 0x169   : > { %v529_v49 = vmax.f32 %v527_v46, %v528_v48 }
 0x16b   : > { %v530_v51 = vpack.c.bf16 %v529_v49, %v529_v49 }
 0x16d   : > { %v541_v52 = vshrl.u32 %v530_v51, 16  ;;  %1028 = vmatmul.mubr.msk.bf16.vlgmr.msra.gmra.mrb[4].mxu1 %vm574_vm11, %v530_v51  ;;  %v544_v55 = vshll.u32 %v530_v51, 16 }
 0x16e   : > { %1040 = vmatpush3.bf16.msra.mxu1 %v1111_v50  ;;  %1043 = vmatprep.mubr.msk.bf16.mxu1 %vm1181_vm1, %v1180_v1 }
 0x16f   : > { %v543_v54 = vrot.slane %v541_v52, 7  ;;  %1041 = vmatprep.subr.bf16.mxu1 %v1180_v1 }
 0x171   : > { %v546_v57 = vor.u32 %v544_v55, %v543_v54 }
 0x172   : > { %1042 = vmatpush3.bf16.msra.mxu1 %v1114_v53 }
 0x173   : > { %v552_v58 = vsel %vm550_vm14, %v546_v57, %v551_v56  ;;  %1055 = vmatprep.subr.bf16.mxu1 %v1180_v1 }
 0x174   : > { %553 = vst [vmem:[#allocation2] sm:$0x7] %v552_v58 }
 0x17b   : > { %v673_v59 = vld [vmem:[#allocation2] sm:$0x3] }
 0x17c   : > { %1044 = vmatmul.mubr.msk.bf16.vlgmr.msra.gmra.mrb[8].mxu1 %vm574_vm11, %v673_v59 }
 0x17d   : > { %1057 = vmatprep.mubr.msk.bf16.mxu1 %vm1181_vm1, %v1180_v1  ;;  %1056 = vmatpush3.bf16.msra.mxu1 %v1115_v60 }
 0x1d8   : > { %v667_v61 = vpop.f32.mrb[8].mxu0 }
 0x1d9   : > { %v1037_v62 = vpop.f32.mrb[9].mxu0 }
 0x1da   : > { %v670_v63 = vpop.f32.mrb[10].mxu0 }
 0x1db   : > { %v1038_v0 = vpop.f32.mrb[11].mxu0 }
 0x1e6   : > { %v790_v2 = vpop.f32.mrb[12].mxu0 }
 0x1e7   : > { %v1053_v3 = vpop.f32.mrb[13].mxu0 }
 0x1e8   : > { %v793_v4 = vpop.f32.mrb[14].mxu0 }
 0x1e9   : > { %v1054_v5 = vpop.f32.mrb[15].mxu0 }
 0x240   : > { %v612_v6 = vpop.f32.mrb[4].mxu1 }
 0x241   : > { %v668_v7 = vadd.f32 %v667_v61, %v612_v6  ;;  %v1029_v8 = vpop.f32.mrb[5].mxu1 }
 0x242   : > { %v615_v9 = vpop.f32.mrb[6].mxu1 }
 0x243   : > { %v1030_v10 = vpop.f32.mrb[7].mxu1 }
 0x24f   : > { %v723_v1 = vpop.f32.mrb[8].mxu1 }
 0x250   : > { %v729_v11 = vadd.f32 %v723_v1, %v668_v7  ;;  %v1045_v12 = vpop.f32.mrb[9].mxu1 }
 0x251   : > { %v726_v14 = vpop.f32.mrb[10].mxu1 }
 0x252   : > { %v796_v15 = vadd.f32 %v790_v2, %v729_v11  ;;  %v1046_v16 = vpop.f32.mrb[11].mxu1 }
 0x254   : > { %v803_v17 = vadd.f32 %v976_v13, %v796_v15 }
 0x256   : > { %v804_v18 = vmul.f32 0.2, %v803_v17 }
 0x258   : > { %v805_v19 = vmax.f32 %v803_v17, %v804_v18 }
 0x25a   : > { %v806_v20 = vpack.c.bf16 %v805_v19, %v805_v19 }
 0x25c   : > { %1058 = vmatmul.mubr.msk.bf16.vlgmr.msra.gmra.mrb[12].mxu1 %vm480_vm3, %v806_v20 }
 0x32f   : > { %v856_v22 = vpop.f32.mrb[12].mxu1 }
 0x330   : > { %v857_v23 = vadd.f32 %v977_v21, %v856_v22  ;;  %v1059_v24 = vpop.f32.mrb[13].mxu1 }
 0x331   : > { %v859_v25 = vpop.f32.mrb[14].mxu1 }
 0x332   : > { %v1060_v26 = vpop.f32.mrb[15].mxu1  ;;  %863 = vst.msk [vmem:[%s323_s24] sm:$0xf] %vm862_vm15, %v857_v23 }
 0x333   : > { %1129 = shalt.err (!%p1126_p3)
}
 0x334   : > { %s1130_s16 = scalar_lea.hbm %s1371_s28, 64  ;;  %s1134_s24 = scalar_lea.hbm %s1422_s9, 128 }
 0x335   : > { %p1131_p4 = scmp.ne.s32.totalorder %s1371_s28, %s1130_s16  ;;  %p1135_p9 = scmp.lt.u32.totalorder %s1371_s28, %s1422_s9 }
 0x336   : > { %p1136_p10 = scmp.lt.u32.totalorder %s1134_s24, %s1130_s16  ;;  %p1138_p12 = scmp.lt.u32.totalorder %s1130_s16, %s1371_s28 }
 0x337   : > { %p1132_p7 = pnand %p1131_p4, %p1272_p5 }
 0x338   : > { %p1137_p11 = por %p1136_p10, %p1135_p9 }
 0x339   : > { %p1133_p8 = pneg %p1132_p7 }
 0x33a   : > { %p1139_p13 = por %p1138_p12, %p1137_p11 }
 0x33c   : > { %p1140_p0 = pnand %p1139_p13, %p1133_p8 }
 0x33e   : > { %1143 = shalt.err (!%p1140_p0)
}
 0x33f   : > { %1061 = dma.vmem_to_hbm [thread:$0]  (%p1272_p5), %s1373_s25, 64, %s1371_s28, %s865_s13  }
 0x340 PF: > { %p1067_p1 = scmp.ge.s32.totalorder %s1178_s12, 2  ;;  %s890_s29 = sand.u32 1, %s1166_s30  }
 0x341   : > { %s891_s14 = scalar_lea.sflag [#allocation5], %s890_s29 }
 0x342   : > { %p1064_p2 = pnand %p1067_p1, %p1276_p6 }
 0x344   : > { %1161 = dma.done.wait (!%p1064_p2), %s891_s14, 64  }
 0x345   : > { %1163 = vsyncadd (!%p1064_p2), %s891_s14, 4294967232  ;;  %p19_p3 = scmp.ge.s32.totalorder %s1259_s15, 4   ;;  %s1425_s30 = smov %s1170_s10 }
 0x346   : > { %s1426_s10 = smov %s1174_s11  ;;  %s1427_s11 = smov %s1270_s18 }
 0x347   : > { %s1428_s12 = smov %s1259_s15  ;;  %21 = sbr.rel (!%p19_p3) target bundleno = 3 (0x3), region = 94 }
 0x34e   :  { %896 = vsyncpa [#allocation5], 1 }
 0x34f   :  { %898 = vsyncpa [#allocation5 + $0x1], 1 }

</bundles_post_ra>
